<compile_context>
chip_gen: v7x
topology: tpu7x:2x2x1
jax: 0.10.0
libtpu: 0.0.40
codegen_flags: <defaults>
</compile_context>

<pallas_src>
import math
import functools

import jax
import jax.numpy as jnp
from jax.experimental import pallas as pl
from jax.experimental.pallas import tpu as pltpu


def _noquery_attn_kernel(k_ref, qx_ref, wk_ref, bk_ref, wp_ref, bp_ref,
                         out_ref, score_ref, *, q_len):
    """One batch block (B_BLK rows) per grid step."""
    b_blk, k_len, e_dim = k_ref.shape
    h_dim = wk_ref.shape[1]

    # Key projection for the whole batch block as one MXU matmul (native dtype
    # operands, f32 accumulation).
    k_flat = k_ref[...].reshape(b_blk * k_len, e_dim)
    kx = jnp.dot(k_flat, wk_ref[...],
                 preferred_element_type=jnp.float32) + bk_ref[...]      # (B*k, H) f32
    kx3 = kx.reshape(b_blk, k_len, h_dim)                               # (B, k, H)

    qx = qx_ref[...]                                                    # (q_len, H) f32

    out_cols = []
    score_cols = []
    for qi in range(q_len):   # static unroll; q_len == 1 by default
        # score[b, k] = <kx[b, k, :], qx[qi, :]>  (VPU multiply + lane reduce).
        s = jnp.sum(kx3 * qx[qi, :][None, None, :], axis=-1)            # (B, k)

        # Numerically stable softmax over k; divide via EUP reciprocal.
        m = jnp.max(s, axis=-1, keepdims=True)
        p = jnp.exp(s - m)
        attn = p * pl.reciprocal(jnp.sum(p, axis=-1, keepdims=True), approx=True)

        # o[b, h] = sum_k attn[b, k] * kx[b, k, h]  (no M=1 matmuls).
        o = jnp.sum(attn[:, :, None] * kx3, axis=1)                     # (B, H) f32

        # Output projection for the whole block.
        out_q = jnp.dot(o, wp_ref[...],
                        preferred_element_type=jnp.float32) + bp_ref[...]

        out_cols.append(out_q)
        score_cols.append(attn)

    out2d = out_cols[0] if q_len == 1 else jnp.concatenate(out_cols, axis=-1)
    score2d = score_cols[0] if q_len == 1 else jnp.concatenate(score_cols, axis=-1)

    out_ref[...] = out2d.astype(out_ref.dtype)
    score_ref[...] = score2d.astype(score_ref.dtype)


def _pick_b_blk(batch, k_len, e_dim, itemsize):
    """Batch-block size: big enough to fill the MXU / amortize per-step
    overhead, multiple of 8 (sublane), VMEM-bounded, and leaving >= 2 grid
    steps when possible so v7x's second TensorCore gets work."""
    if batch <= 8:
        return batch                      # single step; block dims == array dims
    blk = min(64, batch)
    per_batch_bytes = max(1, k_len * e_dim * itemsize)
    blk = min(blk, max(8, (8 << 20) // per_batch_bytes))   # ~8 MiB k-tile cap
    blk = max(8, (blk // 8) * 8)
    if pl.cdiv(batch, blk) < 2:           # keep >= 2 steps (v7x megacore)
        blk = max(8, ((pl.cdiv(batch, 2) + 7) // 8) * 8)
    return min(blk, batch)


def no_query_attention(k, q, w_q, b_q, w_k, b_k, w_p, b_p,
                       *, score_function="dot_product"):
    """
    k:   (B, k_len, E)   input keys/values
    q:   (q_len, E)      learned query parameter (broadcast over batch)
    w_q, w_k: (E, H); b_q, b_k: (H,); w_p: (H, out_dim); b_p: (out_dim,)
    Returns (output (B, q_len, out_dim), score (B, q_len, k_len)).
    Implements n_head=1, dropout=0 (module defaults).
    """
    B, k_len, E = k.shape
    q_len = q.shape[0]
    H = w_k.shape[1]
    out_dim = w_p.shape[1]

    if score_function == "scaled_dot_product":
        scale = 1.0 / math.sqrt(H)
    elif score_function == "dot_product":
        scale = 1.0
    else:
        # TODO(synk): 'mlp' / 'bi_linear' score functions not implemented.
        raise NotImplementedError(score_function)

    # Hoisted, batch-invariant query projection (f32, scale folded in).
    qx = (jnp.dot(q.astype(jnp.float32), w_q.astype(jnp.float32))
          + b_q.astype(jnp.float32)) * scale                   # (q_len, H)

    b_k2 = b_k.reshape(1, H)
    b_p2 = b_p.reshape(1, out_dim)

    itemsize = jnp.dtype(k.dtype).itemsize
    b_blk = _pick_b_blk(B, k_len, E, itemsize)
    grid = (pl.cdiv(B, b_blk),)

    flops = int(B * (2 * k_len * E * H              # key projection
                     + 4 * q_len * k_len * H        # score + weighted sum
                     + 2 * q_len * H * out_dim))    # output projection
    bytes_accessed = int(
        k.size * itemsize
        + (w_k.size + b_k.size + w_p.size + b_p.size) * itemsize
        + qx.size * 4
        + (B * q_len * out_dim + B * q_len * k_len) * itemsize)

    kernel = functools.partial(_noquery_attn_kernel, q_len=q_len)

    out2d, score2d = pl.pallas_call(
        kernel,
        out_shape=(
            jax.ShapeDtypeStruct((B, q_len * out_dim), k.dtype),
            jax.ShapeDtypeStruct((B, q_len * k_len), k.dtype),
        ),
        grid=grid,
        in_specs=[
            pl.BlockSpec((b_blk, k_len, E), lambda b: (b, 0, 0)),   # k (batch block)
            pl.BlockSpec((q_len, H), lambda b: (0, 0)),             # qx (grid-invariant)
            pl.BlockSpec((E, H), lambda b: (0, 0)),                 # w_k
            pl.BlockSpec((1, H), lambda b: (0, 0)),                 # b_k
            pl.BlockSpec((H, out_dim), lambda b: (0, 0)),           # w_proj
            pl.BlockSpec((1, out_dim), lambda b: (0, 0)),           # b_proj
        ],
        out_specs=(
            pl.BlockSpec((b_blk, q_len * out_dim), lambda b: (b, 0)),
            pl.BlockSpec((b_blk, q_len * k_len), lambda b: (b, 0)),
        ),
        compiler_params=pltpu.CompilerParams(
            # Batch-block axis is independent -> shard across the 2 TCs on v7x;
            # neutral on v5e/v6e (1 TC).
            dimension_semantics=("parallel",),
            vmem_limit_bytes=32 * 1024 * 1024,
        ),
        cost_estimate=pl.CostEstimate(
            flops=flops,
            transcendentals=int(B * q_len * k_len),
            bytes_accessed=bytes_accessed,
        ),
    )(k, qx, w_k, b_k2, w_p, b_p2)

    out = out2d.reshape(B, q_len, out_dim)
    score = score2d.reshape(B, q_len, k_len)
    return out, score


def _reference(k, q, w_q, b_q, w_k, b_k, w_p, b_p, scale):
    """Pure-JAX reference of the same forward math (n_head=1, dropout=0)."""
    kx = k @ w_k + b_k                                  # (B, k_len, H)
    qx = (q @ w_q + b_q) * scale                        # (q_len, H)
    s = jnp.einsum("qh,bkh->bqk", qx, kx)               # (B, q_len, k_len)
    attn = jax.nn.softmax(s, axis=-1)
    o = jnp.einsum("bqk,bkh->bqh", attn, kx)            # (B, q_len, H)
    return o @ w_p + b_p, attn


if __name__ == "__main__":
    key = jax.random.PRNGKey(0)

    # Shapes consistent with the module defaults:
    # embed_dim=32, n_head=1 -> hidden=32, out_dim=32, q_len=1, seq(k_len)=8.
    k_len, E = 8, 32
    n_head = 1
    H = E // n_head
    out_dim = E
    q_len = 1

    keys = jax.random.split(key, 10)
    stdv_e = 1.0 / math.sqrt(E)
    stdv_h = 1.0 / math.sqrt(H)

    q_p = jax.random.uniform(keys[1], (q_len, E), minval=-stdv_e, maxval=stdv_e,
                             dtype=jnp.float32)
    w_q = jax.random.uniform(keys[2], (E, H), minval=-stdv_e, maxval=stdv_e,
                             dtype=jnp.float32)
    b_q = jax.random.uniform(keys[3], (H,), minval=-stdv_e, maxval=stdv_e,
                             dtype=jnp.float32)
    w_k = jax.random.uniform(keys[4], (E, H), minval=-stdv_e, maxval=stdv_e,
                             dtype=jnp.float32)
    b_k = jax.random.uniform(keys[5], (H,), minval=-stdv_e, maxval=stdv_e,
                             dtype=jnp.float32)
    w_p = jax.random.uniform(keys[6], (H, out_dim), minval=-stdv_h, maxval=stdv_h,
                             dtype=jnp.float32)
    b_p = jax.random.uniform(keys[7], (out_dim,), minval=-stdv_h, maxval=stdv_h,
                             dtype=jnp.float32)

    params = (q_p, w_q, b_q, w_k, b_k, w_p, b_p)

    # --- Check 1: tiny batch (single grid step), dot_product -------------------
    B1 = 2
    k1 = jax.random.normal(keys[0], (B1, k_len, E), dtype=jnp.float32)
    out1, score1 = no_query_attention(k1, *params, score_function="dot_product")
    out1, score1 = jax.block_until_ready((out1, score1))
    out1_ref, attn1_ref = _reference(k1, *params, scale=1.0)

    assert out1.shape == (B1, q_len, out_dim), out1.shape
    assert score1.shape == (B1, q_len, k_len), score1.shape
    assert jnp.allclose(score1, attn1_ref, atol=5e-3, rtol=5e-3)
    assert jnp.allclose(out1, out1_ref, atol=5e-3, rtol=5e-3)

    # --- Check 2: batch-blocked multi-step grid with a ragged tail,
    #              scaled_dot_product --------------------------------------------
    B2 = 33
    k2 = jax.random.normal(keys[8], (B2, k_len, E), dtype=jnp.float32)
    out2, score2 = no_query_attention(k2, *params,
                                      score_function="scaled_dot_product")
    out2, score2 = jax.block_until_ready((out2, score2))
    out2_ref, attn2_ref = _reference(k2, *params, scale=1.0 / math.sqrt(H))

    assert out2.shape == (B2, q_len, out_dim), out2.shape
    assert score2.shape == (B2, q_len, k_len), score2.shape
    assert jnp.allclose(score2, attn2_ref, atol=5e-3, rtol=5e-3)
    assert jnp.allclose(out2, out2_ref, atol=5e-3, rtol=5e-3)

    print("KERNEL_OK")
</pallas_src>

<mosaic_0001>
module attributes {stable_mosaic.version = 11 : i64} {
  func.func @_noquery_attn_kernel(%arg0: i32, %arg1: memref<2x8x32xf32, #tpu.memory_space<vmem>>, %arg2: memref<1x32xf32, #tpu.memory_space<vmem>>, %arg3: memref<32x32xf32, #tpu.memory_space<vmem>>, %arg4: memref<1x32xf32, #tpu.memory_space<vmem>>, %arg5: memref<32x32xf32, #tpu.memory_space<vmem>>, %arg6: memref<1x32xf32, #tpu.memory_space<vmem>>, %arg7: memref<2x32xf32, #tpu.memory_space<vmem>>, %arg8: memref<2x8xf32, #tpu.memory_space<vmem>>) attributes {dimension_semantics = [#tpu.dimension_semantics<parallel>], iteration_bounds = array<i64: 1>, scalar_prefetch = 0 : i64, scratch_operands = 0 : i64, tpu.core_type = #tpu.core_type<tc>, window_params = [{transform_indices = @transform_0, window_bounds = array<i64: 2, 8, 32>}, {pipeline_mode = #tpu.pipeline_mode<synchronous>, transform_indices = @transform_1, window_bounds = array<i64: 1, 32>}, {pipeline_mode = #tpu.pipeline_mode<synchronous>, transform_indices = @transform_2, window_bounds = array<i64: 32, 32>}, {pipeline_mode = #tpu.pipeline_mode<synchronous>, transform_indices = @transform_3, window_bounds = array<i64: 1, 32>}, {pipeline_mode = #tpu.pipeline_mode<synchronous>, transform_indices = @transform_4, window_bounds = array<i64: 32, 32>}, {pipeline_mode = #tpu.pipeline_mode<synchronous>, transform_indices = @transform_5, window_bounds = array<i64: 1, 32>}, {transform_indices = @transform_6, window_bounds = array<i64: 2, 32>}, {transform_indices = @transform_7, window_bounds = array<i64: 2, 8>}]} {
    %c0 = arith.constant 0 : index
    %c0_0 = arith.constant 0 : index
    %c0_1 = arith.constant 0 : index
    %0 = vector.load %arg1[%c0, %c0_0, %c0_1] : memref<2x8x32xf32, #tpu.memory_space<vmem>>, vector<2x8x32xf32>
    %1 = vector.shape_cast %0 : vector<2x8x32xf32> to vector<16x32xf32>
    %c0_2 = arith.constant 0 : index
    %c0_3 = arith.constant 0 : index
    %2 = vector.load %arg3[%c0_2, %c0_3] : memref<32x32xf32, #tpu.memory_space<vmem>>, vector<32x32xf32>
    %cst = arith.constant dense<0.000000e+00> : vector<16x32xf32>
    %3 = tpu.matmul %1, %2, %cst {dimension_numbers = #tpu.dot_dimension_numbers<[1], [0], [0], [1], [0, 0, 1, 1], [], []>} : vector<16x32xf32>, vector<32x32xf32>, vector<16x32xf32> -> vector<16x32xf32>
    %c0_4 = arith.constant 0 : index
    %c0_5 = arith.constant 0 : index
    %4 = vector.load %arg4[%c0_4, %c0_5] : memref<1x32xf32, #tpu.memory_space<vmem>>, vector<1x32xf32>
    %5 = vector.broadcast %4 : vector<1x32xf32> to vector<16x32xf32>
    %6 = arith.addf %3, %5 : vector<16x32xf32>
    %7 = vector.shape_cast %6 : vector<16x32xf32> to vector<2x8x32xf32>
    %c0_6 = arith.constant 0 : index
    %c0_7 = arith.constant 0 : index
    %8 = vector.load %arg2[%c0_6, %c0_7] : memref<1x32xf32, #tpu.memory_space<vmem>>, vector<1x32xf32>
    %9 = vector.shape_cast %8 : vector<1x32xf32> to vector<32xf32>
    %10 = vector.shape_cast %9 : vector<32xf32> to vector<1x1x32xf32>
    %11 = vector.broadcast %10 : vector<1x1x32xf32> to vector<2x8x32xf32>
    %12 = arith.mulf %7, %11 : vector<2x8x32xf32>
    %cst_8 = arith.constant dense<0.000000e+00> : vector<2x8xf32>
    %13 = vector.multi_reduction <add>, %12, %cst_8 [2] : vector<2x8x32xf32> to vector<2x8xf32>
    %cst_9 = arith.constant dense<0xFF800000> : vector<2xf32>
    %14 = vector.multi_reduction <maximumf>, %13, %cst_9 [1] : vector<2x8xf32> to vector<2xf32>
    %15 = vector.shape_cast %14 : vector<2xf32> to vector<2x1xf32>
    %16 = vector.broadcast %15 : vector<2x1xf32> to vector<2x8xf32>
    %17 = arith.subf %13, %16 : vector<2x8xf32>
    %18 = math.exp %17 : vector<2x8xf32>
    %cst_10 = arith.constant dense<0.000000e+00> : vector<2xf32>
    %19 = vector.multi_reduction <add>, %18, %cst_10 [1] : vector<2x8xf32> to vector<2xf32>
    %20 = vector.shape_cast %19 : vector<2xf32> to vector<2x1xf32>
    %21 = tpu.reciprocal %20 {approx = true} : vector<2x1xf32> -> vector<2x1xf32>
    %22 = vector.broadcast %21 : vector<2x1xf32> to vector<2x8xf32>
    %23 = arith.mulf %18, %22 : vector<2x8xf32>
    %24 = vector.shape_cast %23 : vector<2x8xf32> to vector<2x8x1xf32>
    %25 = vector.broadcast %24 : vector<2x8x1xf32> to vector<2x8x32xf32>
    %26 = arith.mulf %25, %7 : vector<2x8x32xf32>
    %cst_11 = arith.constant dense<0.000000e+00> : vector<2x32xf32>
    %27 = vector.multi_reduction <add>, %26, %cst_11 [1] : vector<2x8x32xf32> to vector<2x32xf32>
    %c0_12 = arith.constant 0 : index
    %c0_13 = arith.constant 0 : index
    %28 = vector.load %arg5[%c0_12, %c0_13] : memref<32x32xf32, #tpu.memory_space<vmem>>, vector<32x32xf32>
    %cst_14 = arith.constant dense<0.000000e+00> : vector<2x32xf32>
    %29 = tpu.matmul %27, %28, %cst_14 {dimension_numbers = #tpu.dot_dimension_numbers<[1], [0], [0], [1], [0, 0, 1, 1], [], []>} : vector<2x32xf32>, vector<32x32xf32>, vector<2x32xf32> -> vector<2x32xf32>
    %c0_15 = arith.constant 0 : index
    %c0_16 = arith.constant 0 : index
    %30 = vector.load %arg6[%c0_15, %c0_16] : memref<1x32xf32, #tpu.memory_space<vmem>>, vector<1x32xf32>
    %31 = vector.broadcast %30 : vector<1x32xf32> to vector<2x32xf32>
    %32 = arith.addf %29, %31 : vector<2x32xf32>
    %c0_17 = arith.constant 0 : index
    %c0_18 = arith.constant 0 : index
    %33 = vector.load %arg7[%c0_17, %c0_18] : memref<2x32xf32, #tpu.memory_space<vmem>>, vector<2x32xf32>
    tpu.vector_store %arg7[%c0_17, %c0_18], %32 {strides = array<i32>} : memref<2x32xf32, #tpu.memory_space<vmem>>, vector<2x32xf32>,
    %c0_19 = arith.constant 0 : index
    %c0_20 = arith.constant 0 : index
    %34 = vector.load %arg8[%c0_19, %c0_20] : memref<2x8xf32, #tpu.memory_space<vmem>>, vector<2x8xf32>
    tpu.vector_store %arg8[%c0_19, %c0_20], %23 {strides = array<i32>} : memref<2x8xf32, #tpu.memory_space<vmem>>, vector<2x8xf32>,
    return
  }
  func.func @transform_0(%arg0: i32) -> (i32, i32, i32) {
    %c0_i32 = arith.constant 0 : i32
    %c0_i32_0 = arith.constant 0 : i32
    %c0_i32_1 = arith.constant 0 : i32
    return %arg0, %c0_i32, %c0_i32_0 : i32, i32, i32
  }
  func.func @transform_1(%arg0: i32) -> (i32, i32) {
    %c0_i32 = arith.constant 0 : i32
    %c0_i32_0 = arith.constant 0 : i32
    %c0_i32_1 = arith.constant 0 : i32
    return %c0_i32, %c0_i32_0 : i32, i32
  }
  func.func @transform_2(%arg0: i32) -> (i32, i32) {
    %c0_i32 = arith.constant 0 : i32
    %c0_i32_0 = arith.constant 0 : i32
    %c0_i32_1 = arith.constant 0 : i32
    return %c0_i32, %c0_i32_0 : i32, i32
  }
  func.func @transform_3(%arg0: i32) -> (i32, i32) {
    %c0_i32 = arith.constant 0 : i32
    %c0_i32_0 = arith.constant 0 : i32
    %c0_i32_1 = arith.constant 0 : i32
    return %c0_i32, %c0_i32_0 : i32, i32
  }
  func.func @transform_4(%arg0: i32) -> (i32, i32) {
    %c0_i32 = arith.constant 0 : i32
    %c0_i32_0 = arith.constant 0 : i32
    %c0_i32_1 = arith.constant 0 : i32
    return %c0_i32, %c0_i32_0 : i32, i32
  }
  func.func @transform_5(%arg0: i32) -> (i32, i32) {
    %c0_i32 = arith.constant 0 : i32
    %c0_i32_0 = arith.constant 0 : i32
    %c0_i32_1 = arith.constant 0 : i32
    return %c0_i32, %c0_i32_0 : i32, i32
  }
  func.func @transform_6(%arg0: i32) -> (i32, i32) {
    %c0_i32 = arith.constant 0 : i32
    %c0_i32_0 = arith.constant 0 : i32
    return %arg0, %c0_i32 : i32, i32
  }
  func.func @transform_7(%arg0: i32) -> (i32, i32) {
    %c0_i32 = arith.constant 0 : i32
    %c0_i32_0 = arith.constant 0 : i32
    return %arg0, %c0_i32 : i32, i32
  }
}

</mosaic_0001>

<bundles_post_ra>
// kernel: tpu_custom_call.1
= control target key start
LH: loop header
LB: loop body
LE: loop exit
PB: predicated region body
PF: predicated region fallthrough
CT: control target
= control target key end

     0   :  { %13 = vsyncpa [#allocation3], 0  ;;  %s760_s0 = inlined_call_operand.hbm [shape: f32[2,8,32], index: 0, kind: input, shape index: {}]   ;;  %s761_s1 = inlined_call_operand.vmem [shape: f32[1,32], index: 1, kind: input, shape index: {}]   ;;  %s762_s2 = inlined_call_operand.hbm [shape: f32[32,32], index: 2, kind: input, shape index: {}]   ;;  %s763_s3 = inlined_call_operand.vmem [shape: f32[1,32], index: 3, kind: input, shape index: {}]   ;;  %s764_s4 = inlined_call_operand.hbm [shape: f32[32,32], index: 4, kind: input, shape index: {}]   ;;  %s765_s5 = inlined_call_operand.vmem [shape: f32[1,32], index: 5, kind: input, shape index: {}]   ;;  %s766_s6 = inlined_call_operand.hbm [shape: f32[2,32], index: 6, kind: output, shape index: {0}]   ;;  %s767_s7 = inlined_call_operand.hbm [shape: f32[2,8], index: 7, kind: output, shape index: {1}]  }
   0x1   :  { %14 = vsyncpa [#allocation6], 0 }
   0x2   :  { %15 = vsyncpa [#allocation4], 0 }
   0x3   :  { %16 = vsyncpa [#allocation10], 0  ;;  %s594_s24 = smov [#allocation5]   ;;  %s595_s26 = smov [#allocation2]  }
   0x4   :  { %s36_s25 = sshll.u32 %s594_s24, 4  ;;  %s22_s27 = sshll.u32 %s595_s26, 4  ;;  %s37_s25 = int_to_ptr.vmem [resolvable:$true] %s36_s25  ;;  %s645_s27 = int_to_ptr.vmem [resolvable:$true] %s22_s27 }
   0x5   :  { %s476_s30 = scalar_lea.hbm %s762_s2, 512 }
   0x6   :  { %p477_p0 = scmp.ne.s32.totalorder %s762_s2, %s476_s30  ;;  %p480_p1 = scmp.lt.u32.totalorder %s476_s30, %s762_s2 }
   0x8   :  { %p482_p2 = pnand %p480_p1, %p477_p0 }
   0xa   :  { %485 = shalt.err (!%p482_p2)
}
   0xb   :  { %s486_s12 = scalar_lea.vmem %s37_s25, 512  ;;  %p491_p4 = scmp.lt.s32.totalorder %s37_s25, %s37_s25 }
   0xc   :  { %p487_p3 = scmp.ne.s32.totalorder %s37_s25, %s486_s12  ;;  %p492_p5 = scmp.lt.s32.totalorder %s486_s12, %s486_s12 }
   0xe   :  { %p493_p6 = por %p492_p5, %p491_p4 }
  0x10   :  { %p494_p7 = pnand %p493_p6, %p487_p3 }
  0x12   :  { %497 = shalt.err (!%p494_p7)
}
  0x13   :  { %s596_s13 = smov 128   ;;  %s597_s14 = smov 8  }
  0x14   :  { %42 = dma.hbm_to_vmem [thread:$0]  %s762_s2, 512, %s37_s25, [#allocation6], %s596_s13, %s596_s13, %s597_s14  }
  0x15   :  { %s498_s19 = scalar_lea.hbm %s760_s0, 256 }
  0x16   :  { %p499_p8 = scmp.ne.s32.totalorder %s760_s0, %s498_s19  ;;  %p502_p9 = scmp.lt.u32.totalorder %s498_s19, %s760_s0 }
  0x18   :  { %p504_p10 = pnand %p502_p9, %p499_p8 }
  0x1a   :  { %507 = shalt.err (!%p504_p10)
}
  0x1b   :  { %s508_s24 = scalar_lea.vmem %s645_s27, 256  ;;  %p513_p12 = scmp.lt.s32.totalorder %s645_s27, %s645_s27 }
  0x1c   :  { %p509_p11 = scmp.ne.s32.totalorder %s645_s27, %s508_s24  ;;  %p514_p13 = scmp.lt.s32.totalorder %s508_s24, %s508_s24 }
  0x1e   :  { %p515_p0 = por %p514_p13, %p513_p12 }
  0x20   :  { %p516_p1 = pnand %p515_p0, %p509_p11 }
  0x22   :  { %519 = shalt.err (!%p516_p1)
}
  0x23   :  { %28 = dma.hbm_to_vmem [thread:$0]  %s760_s0, 256, %s645_s27, [#allocation3], %s596_s13, %s596_s13, %s597_s14  }
  0x24   :  { %s598_s26 = smov [#allocation7]   ;;  %s520_s8 = scalar_lea.hbm %s764_s4, 512 }
  0x25   :  { %s50_s28 = sshll.u32 %s598_s26, 4  ;;  %p521_p2 = scmp.ne.s32.totalorder %s764_s4, %s520_s8  ;;  %s51_s28 = int_to_ptr.vmem [resolvable:$true] %s50_s28 }
  0x26   :  { %p524_p3 = scmp.lt.u32.totalorder %s520_s8, %s764_s4 }
  0x28   :  { %p526_p4 = pnand %p524_p3, %p521_p2 }
  0x2a   :  { %529 = shalt.err (!%p526_p4)
}
  0x2b   :  { %s530_s15 = scalar_lea.vmem %s51_s28, 512  ;;  %p535_p6 = scmp.lt.s32.totalorder %s51_s28, %s51_s28 }
  0x2c   :  { %p531_p5 = scmp.ne.s32.totalorder %s51_s28, %s530_s15  ;;  %p536_p7 = scmp.lt.s32.totalorder %s530_s15, %s530_s15 }
  0x2e   :  { %p537_p8 = por %p536_p7, %p535_p6 }
  0x30   :  { %p538_p9 = pnand %p537_p8, %p531_p5 }
  0x32   :  { %541 = shalt.err (!%p538_p9)
}
  0x33   :  { %56 = dma.hbm_to_vmem [thread:$0]  %s764_s4, 512, %s51_s28, [#allocation6], %s596_s13, %s596_s13, %s597_s14  }
  0x34   :  { %586 = dma.done.wait [#allocation3], 256  }
  0x35   :  { %587 = vsyncadd [#allocation3], 4294967040 }
  0x36   :  { %588 = dma.done.wait [#allocation6], 1024  }
  0x37   :  { %589 = vsyncadd [#allocation6], 4294966272  ;;  %vm81_vm0 = vcmask 261120   ;;  %v70_v0 = vld [vmem:[#allocation5] sm:$0xff]  ;;  %v71_v1 = vld [vmem:[#allocation5 + $0x8] sm:$0xff]  ;;  %v180_v18 = vlaneseq  ;;  %vm190_vm1 = vcmask 1041409  }
  0x38   :  { %v72_v2 = vld [vmem:[#allocation5 + $0x10] sm:$0xff]  ;;  %v443_v3 = vpack.c.bf16 %v71_v1, %v70_v0  ;;  %v73_v4 = vld [vmem:[#allocation5 + $0x18] sm:$0xff]  ;;  %vm193_vm2 = vcmask 58368   ;;  %v599_v28 = vmov 0   ;;  %v275_v52 = vld [vmem:[#allocation7] sm:$0xff]  ;;  %v600_v55 = vmov 0.0|0.0  }
  0x39   :  { %v68_v5 = vld [vmem:[#allocation2] sm:$0xff]  ;;  %v447_v6 = vpack.c.bf16 %v73_v4, %v72_v2  ;;  %v69_v7 = vld [vmem:[#allocation2 + $0x8] sm:$0xff]  ;;  %v181_v19 = vand.u32 127, %v180_v18  ;;  %v183_v20 = vshrl.u32 %v180_v18, 7  ;;  %469 = vset.pattern.permute.xlu0 %v599_v28  ;;  %468 = vset.pattern.permute.xlu1 %v599_v28  ;;  %v276_v53 = vld [vmem:[#allocation7 + $0x8] sm:$0xff]  ;;  %vm601_vm3 = vmmov 0  }
  0x3a   :  { %429 = vmatprep.mubr.msk.f32.mxu0 %vm81_vm0, %v68_v5  ;;  %444 = vmatprep.subr.bf16.mxu0 %v443_v3  ;;  %v404_v8 = vld [vmem:[%s763_s3] ss:$0 sm:$0xff]  ;;  %v452_v54 = vpack.c.bf16 %v276_v53, %v275_v52  ;;  %v278_v57 = vld [vmem:[#allocation7 + $0x18] sm:$0xff]  ;;  %v602_v59 = vmov 0.0  }
  0x3b   :  { %446 = vmatpush3.bf16.msra.mxu0 %v443_v3  ;;  %v407_v11 = vld [vmem:[%s761_s1] ss:$0 sm:$0xff]  ;;  %v713_v22 = vsub.s32 %v181_v19, %v183_v20  ;;  %v200_v29 = vsub.s32 0, %v183_v20  ;;  %v204_v30 = vsub.s32 1, %v183_v20  ;;  %451 = vmatprep.subr.bf16.mxu1 %v600_v55  ;;  %s603_s1 = smov [#allocation9]  }
  0x3c   :  { %448 = vmatprep.subr.bf16.mxu0 %v447_v6  ;;  %453 = vmatpush3.bf16.msra.mxu1 %v452_v54  ;;  %v277_v56 = vld [vmem:[#allocation7 + $0x10] sm:$0xff]  ;;  %s390_s3 = sshll.u32 %s603_s1, 4  ;;  %s391_s3 = int_to_ptr.vmem [resolvable:$true] %s390_s3 }
  0x3d   :  { %454 = vmatprep.subr.bf16.mxu1 %v600_v55  ;;  %v455_v58 = vpack.c.bf16 %v278_v57, %v277_v56  ;;  %440 = vmatprep.mubr.msk.f32.mxu1 %vm601_vm3, %v602_v59  ;;  %s542_s17 = scalar_lea.vmem %s391_s3, 32  ;;  %p547_p11 = scmp.lt.s32.totalorder %s391_s3, %s391_s3 }
  0x3e   :  { %p543_p10 = scmp.ne.s32.totalorder %s391_s3, %s542_s17  ;;  %p548_p12 = scmp.lt.s32.totalorder %s542_s17, %s542_s17 }
  0x3f   :  { %450 = vmatpush3.bf16.msra.mxu0 %v447_v6 }
  0x40   :  { %456 = vmatpush3.bf16.msra.mxu1 %v455_v58  ;;  %p549_p13 = por %p548_p12, %p547_p11 }
  0x42   :  { %430 = vmatmul.mubr.msk.f32.vlgmr.msra.gmra.mrb[0].mxu0 %vm81_vm0, %v69_v7  ;;  %p550_p0 = pnand %p549_p13, %p543_p10 }
 0x115   :  { %v431_v9 = vpop.f32.mrb[0].mxu0 }
 0x116   :  { %v154_v10 = vpop.f32.mrb[1].mxu0  ;;  %v705_v12 = vadd.f32 %v431_v9, %v404_v8 }
 0x117   :  { %v707_v13 = vadd.f32 %v404_v8, %v154_v10 }
 0x118   :  { %v171_v16 = vmul.f32 %v407_v11, %v705_v12 }
 0x119   :  { %v170_v14 = vmul.f32 %v407_v11, %v707_v13 }
 0x11a   :  { %v175_v17 = vsel %vm81_vm0, %v171_v16, 0.0 }
 0x11b   :  { %v172_v15 = vsel %vm81_vm0, %v170_v14, 0.0 }
 0x11c   :  { %173 = vadd.xlane.f32.xlu0 %v172_v15 }
 0x120   :  { %176 = vadd.xlane.f32.xlu0 %v175_v17 }
 0x1a9   :  { %v174_v21 = vpop.xlane.xlu0 %173 }
 0x1aa   :  { %v185_v24 = vrot.slane %v174_v21, %v713_v22 }
 0x1ad   :  { %v177_v23 = vpop.xlane.xlu0 %176 }
 0x1ae   :  { %v189_v25 = vrot.slane %v177_v23, %v713_v22 }
 0x1b0   :  { %v191_v26 = vsel %vm190_vm1, %v189_v25, %v185_v24 }
 0x1b1   :  { %v194_v27 = vsel %vm193_vm2, %v191_v26, -inf }
 0x1b2   :  { %195 = vmax.xlane.f32.xlu1 %v194_v27 }
 0x23f   :  { %v196_v31 = vpop.xlane.xlu1 %195 }
 0x240   :  { %v201_v32 = vrot.slane %v196_v31, %v200_v29  ;;  %v205_v33 = vrot.slane %v196_v31, %v204_v30 }
 0x242   :  { %v208_v34 = vsub.f32 %v174_v21, %v201_v32  ;;  %v209_v35 = vsub.f32 %v177_v23, %v205_v33 }
 0x244   :  { %v210_v36 = vmul.f32 1.442695, %v208_v34  ;;  %v212_v37 = vmul.f32 1.442695, %v209_v35 }
 0x246   :  { %470 = vpow2.f32 %v210_v36 }
 0x247   :  { %472 = vpow2.f32 %v212_v37 }
 0x250   :  { %v471_v38 = vpop.eup %470 }
 0x251   :  { %v473_v39 = vpop.eup %472  ;;  %217 = vperm.xlu1 %468, %v471_v38  }
 0x252   :  { %220 = vperm.xlu0 %469, %v473_v39  }
 0x2d0   :  { %v218_v40 = vpop.permute.xlu1 %217 }
 0x2d1   :  { %v221_v41 = vpop.permute.xlu0 %220  ;;  %v225_v42 = vrot.slane %v218_v40, %v713_v22 }
 0x2d2   :  { %v229_v43 = vrot.slane %v221_v41, %v713_v22 }
 0x2d4   :  { %v230_v44 = vsel %vm190_vm1, %v229_v43, %v225_v42 }
 0x2d5   :  { %v232_v45 = vsel %vm193_vm2, %v230_v44, 0.0 }
 0x2d6   :  { %233 = vadd.xlane.f32.xlu1 %v232_v45 }
 0x363   :  { %v234_v46 = vpop.xlane.xlu1 %233 }
 0x364   :  { %474 = vrcp.f32 %v234_v46 }
 0x36e   :  { %v475_v47 = vpop.eup %474 }
 0x36f   :  { %v240_v48 = vrot.slane %v475_v47, %v200_v29  ;;  %v244_v50 = vrot.slane %v475_v47, %v204_v30 }
 0x371   :  { %v247_v49 = vmul.f32 %v471_v38, %v240_v48  ;;  %v248_v51 = vmul.f32 %v473_v39, %v244_v50 }
 0x373   :  { %251 = vperm.xlu0 %469, %v247_v49  }
 0x377   :  { %256 = vperm.xlu0 %469, %v248_v51  }
 0x3f2   :  { %v252_v60 = vpop.permute.xlu0 %251 }
 0x3f3   :  { %v259_v61 = vmul.f32 %v252_v60, %v707_v13  ;;  %v366_v1 = vrot.slane %v252_v60, %v713_v22 }
 0x3f5   :  { %v261_v62 = vsel %vm81_vm0, %v259_v61, 0.0 }
 0x3f6   :  { %v262_v63 = vrot.slane %v261_v62, 4  ;;  %v257_v0 = vpop.permute.xlu0 %256 }
 0x3f7   :  { %v260_v2 = vmul.f32 %v257_v0, %v705_v12  ;;  %v370_v3 = vrot.slane %v257_v0, %v713_v22 }
 0x3f8   :  { %v263_v4 = vadd.f32 %v262_v63, %v261_v62 }
 0x3f9   :  { %v268_v5 = vsel %vm81_vm0, %v260_v2, 0.0  ;;  %v371_v6 = vsel %vm190_vm1, %v370_v3, %v366_v1 }
 0x3fa   :  { %v264_v7 = vrot.slane %v263_v4, 2  ;;  %v269_v8 = vrot.slane %v268_v5, 4  ;;  %373 = vst.msk [vmem:[#allocation9] sm:$0x3] %vm193_vm2, %v371_v6 }
 0x3fc   :  { %v265_v9 = vadd.f32 %v264_v7, %v263_v4  ;;  %v270_v10 = vadd.f32 %v269_v8, %v268_v5 }
 0x3fe   :  { %v271_v11 = vrot.slane %v270_v10, 2  ;;  %v266_v13 = vrot.slane %v265_v9, 1 }
 0x400   :  { %v272_v14 = vadd.f32 %v271_v11, %v270_v10  ;;  %v267_v17 = vadd.f32 %v266_v13, %v265_v9 }
 0x402   :  { %v273_v15 = vrot.slane %v272_v14, 1 }
 0x404   :  { %v274_v16 = vadd.f32 %v273_v15, %v272_v14 }
 0x406   :  { %v288_v12 = vsel %vm190_vm1, %v274_v16, %v267_v17 }
 0x407   :  { %441 = vmatmul.mubr.msk.f32.vlgmr.msra.gmra.mrb[0].mxu1 %vm81_vm0, %v288_v12 }
 0x408   :  { %553 = shalt.err (!%p550_p0)
}
 0x409   :  { %s554_s20 = scalar_lea.hbm %s767_s7, 32 }
 0x40a   :  { %p555_p1 = scmp.ne.s32.totalorder %s767_s7, %s554_s20  ;;  %p558_p2 = scmp.lt.u32.totalorder %s554_s20, %s767_s7 }
 0x40c   :  { %p560_p3 = pnand %p558_p2, %p555_p1 }
 0x40e   :  { %563 = shalt.err (!%p560_p3)
}
 0x40f   :  { %393 = dma.vmem_to_hbm [thread:$0]  %s391_s3, 32, %s767_s7, [#allocation10]   ;;  %v408_v18 = vld [vmem:[%s765_s5] ss:$0 sm:$0xff]  ;;  %vm361_vm4 = vcmask 254976  }
 0x410   :  { %s604_s29 = smov [#allocation8]  }
 0x411   :  { %s380_s30 = sshll.u32 %s604_s29, 4  ;;  %s381_s30 = int_to_ptr.vmem [resolvable:$true] %s380_s30 }
 0x412   :  { %s564_s8 = scalar_lea.vmem %s381_s30, 32  ;;  %p569_p5 = scmp.lt.s32.totalorder %s381_s30, %s381_s30 }
 0x413   :  { %p565_p4 = scmp.ne.s32.totalorder %s381_s30, %s564_s8  ;;  %p570_p6 = scmp.lt.s32.totalorder %s564_s8, %s564_s8 }
 0x415   :  { %p571_p7 = por %p570_p6, %p569_p5 }
 0x417   :  { %p572_p8 = pnand %p571_p7, %p565_p4 }
 0x4da   :  { %v357_v19 = vpop.f32.mrb[0].mxu1 }
 0x4db   :  { %v358_v20 = vadd.f32 %v408_v18, %v357_v19  ;;  %v442_v21 = vpop.f32.mrb[1].mxu1 }
 0x4dd   :  { %362 = vst.msk [vmem:[#allocation8] sm:$0x3] %vm361_vm4, %v358_v20 }
 0x4de   :  { %575 = shalt.err (!%p572_p8)
}
 0x4df   :  { %s576_s10 = scalar_lea.hbm %s766_s6, 32 }
 0x4e0   :  { %p577_p9 = scmp.ne.s32.totalorder %s766_s6, %s576_s10  ;;  %p580_p10 = scmp.lt.u32.totalorder %s576_s10, %s766_s6 }
 0x4e2   :  { %p582_p11 = pnand %p580_p10, %p577_p9 }
 0x4e4   :  { %585 = shalt.err (!%p582_p11)
}
 0x4e5   :  { %383 = dma.vmem_to_hbm [thread:$0]  %s381_s30, 32, %s766_s6, [#allocation4]  }
 0x4e6   :  { %590 = dma.done.wait [#allocation4], 32  }
 0x4e7   :  { %591 = vsyncadd [#allocation4], 4294967264 }
 0x4e8   :  { %592 = dma.done.wait [#allocation10], 32  }
 0x4e9   :  { %593 = vsyncadd [#allocation10], 4294967264 }
 0x4ea   :  { %400 = vsyncpa [#allocation3], 1 }
 0x4eb   :  { %401 = vsyncpa [#allocation6], 1 }
 0x4ec   :  { %402 = vsyncpa [#allocation4], 1 }
 0x4ed   :  { %403 = vsyncpa [#allocation10], 1 }

</bundles_post_ra>
